<compile_context>
chip_gen: v6e
topology: v6e:2x2x1
jax: 0.10.0
libtpu: 0.0.40
codegen_flags: <defaults>
</compile_context>

<pallas_src>
import functools
import math

import jax
import jax.numpy as jnp
import numpy as np
from jax.experimental import pallas as pl
from jax.experimental.pallas import tpu as pltpu


# ----------------------------- Pallas kernel ------------------------------- #
def _scaled_leaky_relu_kernel(x_ref, o_ref, *, negative_slope, scale):
    x = x_ref[...].astype(jnp.float32)
    out = jnp.where(x >= 0.0, x, x * negative_slope) * scale
    o_ref[...] = out.astype(o_ref.dtype)


# ------------------------------ JAX wrapper -------------------------------- #
def scaled_leaky_relu(x, negative_slope=0.2, tile_rows=512, tile_cols=1024):
    """ScaledLeakyReLU.forward: leaky_relu(x, slope) * sqrt(2), any shape/dtype."""
    orig_shape = x.shape
    dtype = x.dtype
    total = math.prod(orig_shape)

    # Lane-dense layout: flatten -> (rows, tile_cols), tile_cols % 128 == 0.
    tc = tile_cols
    rows = -(-total // tc)
    # Row-block must be a multiple of 8 (sublane) unless it is the full extent.
    tr = min(tile_rows, ((rows + 7) // 8) * 8)
    rows_padded = ((rows + tr - 1) // tr) * tr
    padded_total = rows_padded * tc

    x_flat = x.reshape(-1)
    if padded_total != total:
        x_flat = jnp.pad(x_flat, (0, padded_total - total))
    x2 = x_flat.reshape(rows_padded, tc)

    kernel = functools.partial(
        _scaled_leaky_relu_kernel,
        negative_slope=float(negative_slope),
        scale=math.sqrt(2.0),
    )

    out2 = pl.pallas_call(
        kernel,
        out_shape=jax.ShapeDtypeStruct((rows_padded, tc), dtype),
        grid=(rows_padded // tr,),
        in_specs=[pl.BlockSpec((tr, tc), lambda i: (i, 0))],
        out_specs=pl.BlockSpec((tr, tc), lambda i: (i, 0)),
        compiler_params=pltpu.CompilerParams(
            dimension_semantics=("parallel",),
            vmem_limit_bytes=32 * 1024 * 1024,
        ),
    )(x2)

    out_flat = out2.reshape(-1)
    if padded_total != total:
        out_flat = out_flat[:total]
    return out_flat.reshape(orig_shape)


# -------------------------- pure-JAX reference ------------------------------ #
def scaled_leaky_relu_ref(x, negative_slope=0.2):
    xf = x.astype(jnp.float32)
    out = jnp.where(xf >= 0.0, xf, xf * negative_slope) * math.sqrt(2.0)
    return out.astype(x.dtype)


# ---------------------------------- main ------------------------------------ #
if __name__ == "__main__":
    key = jax.random.PRNGKey(0)
    B, C, H, W = 2, 4, 16, 16
    x = jax.random.normal(key, (B, C, H, W), jnp.float32)

    # f32 path
    out = scaled_leaky_relu(x)
    out = jax.block_until_ready(out)
    ref = scaled_leaky_relu_ref(x)
    assert out.shape == x.shape
    assert out.dtype == x.dtype
    assert np.allclose(np.asarray(out), np.asarray(ref), rtol=1e-6, atol=1e-6)

    # bf16 path (dtype preserved through the kernel; f32 math inside).
    x_bf16 = x.astype(jnp.bfloat16)
    out_bf16 = jax.block_until_ready(scaled_leaky_relu(x_bf16))
    ref_bf16 = scaled_leaky_relu_ref(x_bf16)
    assert out_bf16.dtype == jnp.bfloat16
    assert np.allclose(
        np.asarray(jnp.asarray(out_bf16, jnp.float32)),
        np.asarray(jnp.asarray(ref_bf16, jnp.float32)),
        rtol=2e-2, atol=2e-2)

    print("KERNEL_OK")
</pallas_src>

<mosaic_0001>
module attributes {stable_mosaic.version = 11 : i64} {
  func.func @_scaled_leaky_relu_kernel(%arg0: i32, %arg1: memref<8x1024xf32, #tpu.memory_space<vmem>>, %arg2: memref<8x1024xf32, #tpu.memory_space<vmem>>) attributes {dimension_semantics = [#tpu.dimension_semantics<parallel>], iteration_bounds = array<i64: 1>, scalar_prefetch = 0 : i64, scratch_operands = 0 : i64, tpu.core_type = #tpu.core_type<tc>, window_params = [{transform_indices = @transform_0, window_bounds = array<i64: 8, 1024>}, {transform_indices = @transform_1, window_bounds = array<i64: 8, 1024>}]} {
    %c0 = arith.constant 0 : index
    %c0_0 = arith.constant 0 : index
    %0 = vector.load %arg1[%c0, %c0_0] : memref<8x1024xf32, #tpu.memory_space<vmem>>, vector<8x1024xf32>
    %cst = arith.constant 0.000000e+00 : f32
    %1 = vector.broadcast %cst : f32 to vector<8x1024xf32>
    %2 = arith.cmpf oge, %0, %1 : vector<8x1024xf32>
    %cst_1 = arith.constant 2.000000e-01 : f32
    %3 = vector.broadcast %cst_1 : f32 to vector<8x1024xf32>
    %4 = arith.mulf %0, %3 : vector<8x1024xf32>
    %5 = arith.select %2, %0, %4 : vector<8x1024xi1>, vector<8x1024xf32>
    %cst_2 = arith.constant 1.41421354 : f32
    %6 = vector.broadcast %cst_2 : f32 to vector<8x1024xf32>
    %7 = arith.mulf %5, %6 : vector<8x1024xf32>
    %c0_3 = arith.constant 0 : index
    %c0_4 = arith.constant 0 : index
    %8 = vector.load %arg2[%c0_3, %c0_4] : memref<8x1024xf32, #tpu.memory_space<vmem>>, vector<8x1024xf32>
    tpu.vector_store %arg2[%c0_3, %c0_4], %7 {strides = array<i32>} : memref<8x1024xf32, #tpu.memory_space<vmem>>, vector<8x1024xf32>,
    return
  }
  func.func @transform_0(%arg0: i32) -> (i32, i32) {
    %c0_i32 = arith.constant 0 : i32
    %c0_i32_0 = arith.constant 0 : i32
    return %arg0, %c0_i32 : i32, i32
  }
  func.func @transform_1(%arg0: i32) -> (i32, i32) {
    %c0_i32 = arith.constant 0 : i32
    %c0_i32_0 = arith.constant 0 : i32
    return %arg0, %c0_i32 : i32, i32
  }
}

</mosaic_0001>

<bundles_post_ra>
// kernel: tpu_custom_call.1
= control target key start
LH: loop header
LB: loop body
LE: loop exit
PB: predicated region body
PF: predicated region fallthrough
CT: control target
= control target key end

     0   :  { %6 = vsyncpa [#allocation3], 0  ;;  %s148_s0 = inlined_call_operand.hbm [shape: f32[8,1024], index: 0, kind: input, shape index: {}]   ;;  %s149_s1 = inlined_call_operand.hbm [shape: f32[8,1024], index: 1, kind: output, shape index: {}]  }
   0x1   :  { %7 = vsyncpa [#allocation4], 0  ;;  %s130_s6 = smov [#allocation2]  }
   0x2   :  { %s14_s7 = sshll.u32 %s130_s6, 4  ;;  %s15_s7 = int_to_ptr.vmem [resolvable:$true] %s14_s7 }
   0x3   :  { %s94_s8 = scalar_lea.vmem %s15_s7, 1024  ;;  %p99_p1 = scmp.lt.s32.totalorder %s15_s7, %s15_s7 }
   0x4   :  { %p95_p0 = scmp.ne.s32.totalorder %s15_s7, %s94_s8  ;;  %p100_p2 = scmp.lt.s32.totalorder %s94_s8, %s94_s8 }
   0x6   :  { %p101_p3 = por %p100_p2, %p99_p1 }
   0x8   :  { %p102_p4 = pnand %p101_p3, %p95_p0 }
   0xa   :  { %105 = shalt.err (!%p102_p4)
}
   0xb   :  { %17 = dma.hbm_to_vmem [thread:$0]  %s148_s0, 1024, %s15_s7, [#allocation3]  }
   0xc   :  { %126 = dma.done.wait [#allocation3], 1024  }
   0xd   :  { %127 = vsyncadd [#allocation3], 4294966272  ;;  %v21_v0 = vld [vmem:[#allocation2] sm:$0xff]  ;;  %v22_v1 = vld [vmem:[#allocation2 + $0x8] sm:$0xff]  ;;  %s131_s0 = smov [#allocation5]  }
   0xe   :  { %v23_v2 = vld [vmem:[#allocation2 + $0x10] sm:$0xff]  ;;  %vm29_vm0 = vcmp.ge.f32.partialorder %v21_v0, 0.0  ;;  %v37_v3 = vmul.f32 0.2, %v21_v0  ;;  %vm30_vm1 = vcmp.ge.f32.partialorder %v22_v1, 0.0  ;;  %v24_v6 = vld [vmem:[#allocation2 + $0x18] sm:$0xff] }
   0xf   :  { %v38_v4 = vmul.f32 0.2, %v22_v1  ;;  %vm31_vm2 = vcmp.ge.f32.partialorder %v23_v2, 0.0  ;;  %v39_v5 = vmul.f32 0.2, %v23_v2  ;;  %v25_v7 = vld [vmem:[#allocation2 + $0x20] sm:$0xff] }
  0x10   :  { %v26_v8 = vld [vmem:[#allocation2 + $0x28] sm:$0xff]  ;;  %v45_v9 = vsel %vm29_vm0, %v21_v0, %v37_v3  ;;  %vm32_vm3 = vcmp.ge.f32.partialorder %v24_v6, 0.0  ;;  %v40_v11 = vmul.f32 0.2, %v24_v6  ;;  %v27_v12 = vld [vmem:[#allocation2 + $0x30] sm:$0xff]  ;;  %v28_v13 = vld [vmem:[#allocation2 + $0x38] sm:$0xff] }
  0x11   :  { %v46_v10 = vsel %vm30_vm1, %v22_v1, %v38_v4  ;;  %v53_v14 = vmul.f32 1.4142135, %v45_v9  ;;  %v47_v16 = vsel %vm31_vm2, %v23_v2, %v39_v5  ;;  %vm33_vm4 = vcmp.ge.f32.partialorder %v25_v7, 0.0  ;;  %s75_s11 = sshll.u32 %s131_s0, 4  ;;  %s76_s11 = int_to_ptr.vmem [resolvable:$true] %s75_s11 }
  0x12   :  { %v54_v15 = vmul.f32 1.4142135, %v46_v10  ;;  %v55_v17 = vmul.f32 1.4142135, %v47_v16  ;;  %v48_v18 = vsel %vm32_vm3, %v24_v6, %v40_v11  ;;  %v41_v19 = vmul.f32 0.2, %v25_v7  ;;  %p111_p6 = scmp.lt.s32.totalorder %s76_s11, %s76_s11 }
  0x13   :  { %vm34_vm5 = vcmp.ge.f32.partialorder %v26_v8, 0.0  ;;  %61 = vst [vmem:[#allocation5] sm:$0xff] %v53_v14  ;;  %v56_v20 = vmul.f32 1.4142135, %v48_v18  ;;  %v42_v21 = vmul.f32 0.2, %v26_v8 }
  0x14   :  { %62 = vst [vmem:[#allocation5 + $0x8] sm:$0xff] %v54_v15  ;;  %vm35_vm6 = vcmp.ge.f32.partialorder %v27_v12, 0.0  ;;  %vm36_vm7 = vcmp.ge.f32.partialorder %v28_v13, 0.0  ;;  %63 = vst [vmem:[#allocation5 + $0x10] sm:$0xff] %v55_v17  ;;  %v49_v22 = vsel %vm33_vm4, %v25_v7, %v41_v19  ;;  %v43_v23 = vmul.f32 0.2, %v27_v12 }
  0x15   :  { %v44_v24 = vmul.f32 0.2, %v28_v13  ;;  %64 = vst [vmem:[#allocation5 + $0x18] sm:$0xff] %v56_v20  ;;  %v57_v25 = vmul.f32 1.4142135, %v49_v22  ;;  %v50_v26 = vsel %vm34_vm5, %v26_v8, %v42_v21  ;;  %s106_s12 = scalar_lea.vmem %s76_s11, 1024 }
  0x16   :  { %v58_v27 = vmul.f32 1.4142135, %v50_v26  ;;  %v51_v28 = vsel %vm35_vm6, %v27_v12, %v43_v23  ;;  %p107_p5 = scmp.ne.s32.totalorder %s76_s11, %s106_s12  ;;  %p112_p7 = scmp.lt.s32.totalorder %s106_s12, %s106_s12 }
  0x17   :  { %v52_v29 = vsel %vm36_vm7, %v28_v13, %v44_v24  ;;  %65 = vst [vmem:[#allocation5 + $0x20] sm:$0xff] %v57_v25  ;;  %v59_v30 = vmul.f32 1.4142135, %v51_v28 }
  0x18   :  { %v60_v31 = vmul.f32 1.4142135, %v52_v29  ;;  %66 = vst [vmem:[#allocation5 + $0x28] sm:$0xff] %v58_v27  ;;  %p113_p8 = por %p112_p7, %p111_p6 }
  0x19   :  { %67 = vst [vmem:[#allocation5 + $0x30] sm:$0xff] %v59_v30 }
  0x1a   :  { %68 = vst [vmem:[#allocation5 + $0x38] sm:$0xff] %v60_v31  ;;  %p114_p9 = pnand %p113_p8, %p107_p5 }
  0x1c   :  { %117 = shalt.err (!%p114_p9)
}
  0x1d   :  { %78 = dma.vmem_to_hbm [thread:$0]  %s76_s11, 1024, %s149_s1, [#allocation4]  }
  0x1e   :  { %128 = dma.done.wait [#allocation4], 1024  }
  0x1f   :  { %129 = vsyncadd [#allocation4], 4294966272 }
  0x20   :  { %82 = vsyncpa [#allocation3], 1 }
  0x21   :  { %83 = vsyncpa [#allocation4], 1 }

</bundles_post_ra>
